<compile_context>
chip_gen: v7x
topology: tpu7x:2x2x1
jax: 0.10.0
libtpu: 0.0.40
codegen_flags: <defaults>
</compile_context>

<pallas_src>
import functools

import jax
import jax.numpy as jnp
from jax.experimental import pallas as pl
from jax.experimental.pallas import tpu as pltpu

LN_EPS = 1e-5   # PyTorch nn.LayerNorm default
LANE = 128
SUBLANE = 8


def _round_up(x, m):
    return (x + m - 1) // m * m


def _pick_th(H, D, budget_bytes=16 * 1024 * 1024):
    """Largest lane-dense H-tile whose double-buffered bf16 (D,th)+(th,D) tiles fit."""
    for th in (1024, 512, 256, 128):
        # 2 weight tiles * 2 buffers * bf16(2B)
        if H % th == 0 and 2 * 2 * (D * th + th * D) * 2 <= budget_bytes * 4:
            if 4 * (D * th) * 2 <= budget_bytes:
                return th
    return H  # tiny / irregular H: use the full dim (still a legal full-extent block)


def _layer_norm(z, gamma, beta):
    mean = jnp.mean(z, axis=-1, keepdims=True)
    cent = z - mean
    var = jnp.mean(cent * cent, axis=-1, keepdims=True)
    return cent * jax.lax.rsqrt(var + LN_EPS) * gamma + beta


# ----------------------------- fused kernel --------------------------------


def fused_mlp_kernel(pos_ref, x_ref, w1_ref, b1_ref, w2_ref, b2_ref,
                     g_ref, bt_ref, hg_ref, hb_ref, hw_ref, hbias_ref,
                     o_ref, h_sc, acc_sc):
    """Grid = (batch_tile i, layer l, hidden_tile k).

    h_sc   : f32 VMEM scratch [tm, D], the resident activation (carried over l, k)
    acc_sc : f32 VMEM scratch [tm, D], the FFN output accumulator over H-tiles
    """
    l = pl.program_id(1)
    k = pl.program_id(2)
    nl = pl.num_programs(1)
    nk = pl.num_programs(2)

    # New batch tile: load input block and add (flattened) position embedding.
    @pl.when(jnp.logical_and(l == 0, k == 0))
    def _():
        h_sc[...] = x_ref[...].astype(jnp.float32) + pos_ref[...]

    # New layer: zero the FFN accumulator.
    @pl.when(k == 0)
    def _():
        acc_sc[...] = jnp.zeros_like(acc_sc)

    # FFN partial over this H-tile: relu(h @ W1[:, k] + b1[k]) @ W2[k, :]
    h_bf16 = h_sc[...].astype(jnp.bfloat16)
    hid = jnp.dot(h_bf16, w1_ref[0], preferred_element_type=jnp.float32)   # [tm, th]
    hid = jnp.maximum(hid + b1_ref[0], 0.0)
    acc_sc[...] += jnp.dot(hid.astype(jnp.bfloat16), w2_ref[0],
                           preferred_element_type=jnp.float32)             # [tm, D]

    # Last H-tile of this layer: bias2 + residual + LayerNorm (all f32).
    @pl.when(k == nk - 1)
    def _():
        z = h_sc[...] + acc_sc[...] + b2_ref[0]
        h_sc[...] = _layer_norm(z, g_ref[0], bt_ref[0])

    # Very last grid step for this batch tile: head LayerNorm + Linear.
    @pl.when(jnp.logical_and(l == nl - 1, k == nk - 1))
    def _():
        zh = _layer_norm(h_sc[...], hg_ref[...], hb_ref[...])
        logits = jnp.dot(zh.astype(jnp.bfloat16), hw_ref[...],
                         preferred_element_type=jnp.float32)
        o_ref[...] = (logits + hbias_ref[...]).astype(o_ref.dtype)


# ----------------------------- wrapper --------------------------------------


@functools.partial(jax.jit, static_argnames=("num_tokens",))
def mlp_forward(params, x, *, num_tokens):
    """x: [B, S, Dm] float32 -> logits [B, num_tokens]."""
    B, S, Dm = x.shape
    D = S * Dm
    assert D % LANE == 0, "flattened feature dim must be a multiple of 128"
    L, _, H = params["w1s"].shape
    Tp = params["head"]["w"].shape[1]

    # Pad batch to sublane multiple and pick the batch tile.
    Bp = _round_up(max(B, SUBLANE), SUBLANE)
    tm = min(Bp, 256)
    Bp = _round_up(Bp, tm)

    x2 = x.reshape(B, D)
    xp = jnp.zeros((Bp, D), x2.dtype).at[:B].set(x2)
    pos = params["pos_emb"].reshape(1, D)

    th = _pick_th(H, D)
    grid = (Bp // tm, L, H // th)

    out = pl.pallas_call(
        fused_mlp_kernel,
        out_shape=jax.ShapeDtypeStruct((Bp, Tp), jnp.float32),
        grid_spec=pltpu.PrefetchScalarGridSpec(
            num_scalar_prefetch=0,
            grid=grid,
            in_specs=[
                pl.BlockSpec((1, D), lambda i, l, k: (0, 0)),          # pos (flat)
                pl.BlockSpec((tm, D), lambda i, l, k: (i, 0)),         # x
                pl.BlockSpec((1, D, th), lambda i, l, k: (l, 0, k)),   # w1 (bf16)
                pl.BlockSpec((1, 1, th), lambda i, l, k: (l, 0, k)),   # b1
                pl.BlockSpec((1, th, D), lambda i, l, k: (l, k, 0)),   # w2 (bf16)
                pl.BlockSpec((1, 1, D), lambda i, l, k: (l, 0, 0)),    # b2
                pl.BlockSpec((1, 1, D), lambda i, l, k: (l, 0, 0)),    # gamma
                pl.BlockSpec((1, 1, D), lambda i, l, k: (l, 0, 0)),    # beta
                pl.BlockSpec((1, D), lambda i, l, k: (0, 0)),          # head gamma
                pl.BlockSpec((1, D), lambda i, l, k: (0, 0)),          # head beta
                pl.BlockSpec((D, Tp), lambda i, l, k: (0, 0)),         # head w (bf16)
                pl.BlockSpec((1, Tp), lambda i, l, k: (0, 0)),         # head b
            ],
            out_specs=pl.BlockSpec((tm, Tp), lambda i, l, k: (i, 0)),
            scratch_shapes=[pltpu.VMEM((tm, D), jnp.float32),   # resident h
                            pltpu.VMEM((tm, D), jnp.float32)],  # FFN accumulator
        ),
        compiler_params=pltpu.CompilerParams(
            dimension_semantics=("parallel", "arbitrary", "arbitrary"),
            vmem_limit_bytes=64 * 1024 * 1024,
        ),
    )(pos, xp,
      params["w1s"], params["b1s"], params["w2s"], params["b2s"],
      params["gammas"], params["betas"],
      params["head"]["gamma"], params["head"]["beta"],
      params["head"]["w"], params["head"]["b"])

    return out[:B, :num_tokens]


# ----------------------------- params ----------------------------------------


def init_params(key, num_layers, dim_model, num_heads, num_tokens, seq_len):
    D = dim_model * seq_len
    assert D % LANE == 0, "flattened feature dim must be a multiple of 128"
    H = D * num_heads
    Tp = _round_up(num_tokens, LANE)

    def unif(k, shape, fan_in):
        bound = 1.0 / jnp.sqrt(jnp.float32(fan_in))
        return jax.random.uniform(k, shape, jnp.float32, -bound, bound)

    key, kp = jax.random.split(key)
    params = {"pos_emb": jax.random.normal(kp, (seq_len, dim_model), jnp.float32)}

    key, k1, k2, k3, k4, k5, k6 = jax.random.split(key, 7)
    # Weights stored as [in, out] (PyTorch W.T), stacked over layers, bf16.
    params["w1s"] = unif(k1, (num_layers, D, H), D).astype(jnp.bfloat16)
    params["b1s"] = unif(k2, (num_layers, 1, H), D)
    params["w2s"] = unif(k3, (num_layers, H, D), H).astype(jnp.bfloat16)
    params["b2s"] = unif(k4, (num_layers, 1, D), H)
    params["gammas"] = jnp.ones((num_layers, 1, D), jnp.float32)
    params["betas"] = jnp.zeros((num_layers, 1, D), jnp.float32)

    hw = unif(k5, (D, num_tokens), D)
    hb = unif(k6, (1, num_tokens), D)
    params["head"] = {
        "gamma": jnp.ones((1, D), jnp.float32),
        "beta": jnp.zeros((1, D), jnp.float32),
        # head output padded up to a lane-dense multiple of 128 (sliced in wrapper)
        "w": jnp.zeros((D, Tp), jnp.float32).at[:, :num_tokens].set(hw).astype(jnp.bfloat16),
        "b": jnp.zeros((1, Tp), jnp.float32).at[:, :num_tokens].set(hb),
    }
    return params


# ----------------------------- reference (pure JAX, same cast pattern) -------


def mlp_forward_ref(params, x, num_tokens):
    B, S, Dm = x.shape
    D = S * Dm
    h = (x + params["pos_emb"][None]).reshape(B, D).astype(jnp.float32)
    L = params["w1s"].shape[0]
    for l in range(L):
        hid = jnp.dot(h.astype(jnp.bfloat16), params["w1s"][l],
                      preferred_element_type=jnp.float32) + params["b1s"][l]
        hid = jnp.maximum(hid, 0.0)
        y = jnp.dot(hid.astype(jnp.bfloat16), params["w2s"][l],
                    preferred_element_type=jnp.float32) + params["b2s"][l]
        h = _layer_norm(h + y, params["gammas"][l], params["betas"][l])
    hd = params["head"]
    zh = _layer_norm(h, hd["gamma"], hd["beta"])
    logits = jnp.dot(zh.astype(jnp.bfloat16), hd["w"],
                     preferred_element_type=jnp.float32) + hd["b"]
    return logits[:, :num_tokens]


# ----------------------------- main -------------------------------------------

if __name__ == "__main__":
    # Small config consistent with the module's forward.
    num_layers, dim_model, num_heads, num_tokens, seq_len = 2, 16, 2, 32, 8
    batch = 2

    key = jax.random.PRNGKey(0)
    key, kx, kp = jax.random.split(key, 3)
    x = jax.random.normal(kx, (batch, seq_len, dim_model), jnp.float32)
    params = init_params(kp, num_layers, dim_model, num_heads, num_tokens, seq_len)

    out = mlp_forward(params, x, num_tokens=num_tokens)
    out = jax.block_until_ready(out)

    ref = mlp_forward_ref(params, x, num_tokens)
    assert out.shape == (batch, num_tokens), out.shape
    max_err = float(jnp.max(jnp.abs(out - ref)))
    assert jnp.allclose(out, ref, atol=5e-3, rtol=5e-3), max_err

    print("KERNEL_OK")
</pallas_src>

<mosaic_0001>
module attributes {stable_mosaic.version = 11 : i64} {
  func.func @fused_mlp_kernel(%arg0: i32, %arg1: i32, %arg2: i32, %arg3: memref<1x128xf32, #tpu.memory_space<vmem>>, %arg4: memref<8x128xf32, #tpu.memory_space<vmem>>, %arg5: memref<1x128x256xbf16, #tpu.memory_space<vmem>>, %arg6: memref<1x1x256xf32, #tpu.memory_space<vmem>>, %arg7: memref<1x256x128xbf16, #tpu.memory_space<vmem>>, %arg8: memref<1x1x128xf32, #tpu.memory_space<vmem>>, %arg9: memref<1x1x128xf32, #tpu.memory_space<vmem>>, %arg10: memref<1x1x128xf32, #tpu.memory_space<vmem>>, %arg11: memref<1x128xf32, #tpu.memory_space<vmem>>, %arg12: memref<1x128xf32, #tpu.memory_space<vmem>>, %arg13: memref<128x128xbf16, #tpu.memory_space<vmem>>, %arg14: memref<1x128xf32, #tpu.memory_space<vmem>>, %arg15: memref<8x128xf32, #tpu.memory_space<vmem>>, %arg16: memref<8x128xf32, #tpu.memory_space<vmem>>, %arg17: memref<8x128xf32, #tpu.memory_space<vmem>>) attributes {dimension_semantics = [#tpu.dimension_semantics<parallel>, #tpu.dimension_semantics<arbitrary>, #tpu.dimension_semantics<arbitrary>], iteration_bounds = array<i64: 1, 2, 1>, scalar_prefetch = 0 : i64, scratch_operands = 2 : i64, tpu.core_type = #tpu.core_type<tc>, window_params = [{pipeline_mode = #tpu.pipeline_mode<synchronous>, transform_indices = @transform_0, window_bounds = array<i64: 1, 128>}, {transform_indices = @transform_1, window_bounds = array<i64: 8, 128>}, {transform_indices = @transform_2, window_bounds = array<i64: 1, 128, 256>}, {transform_indices = @transform_3, window_bounds = array<i64: 1, 1, 256>}, {transform_indices = @transform_4, window_bounds = array<i64: 1, 256, 128>}, {transform_indices = @transform_5, window_bounds = array<i64: 1, 1, 128>}, {transform_indices = @transform_6, window_bounds = array<i64: 1, 1, 128>}, {transform_indices = @transform_7, window_bounds = array<i64: 1, 1, 128>}, {pipeline_mode = #tpu.pipeline_mode<synchronous>, transform_indices = @transform_8, window_bounds = array<i64: 1, 128>}, {pipeline_mode = #tpu.pipeline_mode<synchronous>, transform_indices = @transform_9, window_bounds = array<i64: 1, 128>}, {pipeline_mode = #tpu.pipeline_mode<synchronous>, transform_indices = @transform_10, window_bounds = array<i64: 128, 128>}, {pipeline_mode = #tpu.pipeline_mode<synchronous>, transform_indices = @transform_11, window_bounds = array<i64: 1, 128>}, {transform_indices = @transform_12, window_bounds = array<i64: 8, 128>}]} {
    %c0_i32 = arith.constant 0 : i32
    %0 = arith.cmpi eq, %arg1, %c0_i32 : i32
    %c0_i32_0 = arith.constant 0 : i32
    %1 = arith.cmpi eq, %arg2, %c0_i32_0 : i32
    %2 = arith.andi %0, %1 : i1
    %3 = arith.extui %2 : i1 to i32
    %c0_i32_1 = arith.constant 0 : i32
    %4 = arith.cmpi ne, %3, %c0_i32_1 : i32
    scf.if %4 {
      %c0_24 = arith.constant 0 : index
      %c0_25 = arith.constant 0 : index
      %34 = vector.load %arg4[%c0_24, %c0_25] : memref<8x128xf32, #tpu.memory_space<vmem>>, vector<8x128xf32>
      %c0_26 = arith.constant 0 : index
      %c0_27 = arith.constant 0 : index
      %35 = vector.load %arg3[%c0_26, %c0_27] : memref<1x128xf32, #tpu.memory_space<vmem>>, vector<1x128xf32>
      %36 = vector.broadcast %35 : vector<1x128xf32> to vector<8x128xf32>
      %37 = arith.addf %34, %36 : vector<8x128xf32>
      %c0_28 = arith.constant 0 : index
      %c0_29 = arith.constant 0 : index
      %38 = vector.load %arg16[%c0_28, %c0_29] : memref<8x128xf32, #tpu.memory_space<vmem>>, vector<8x128xf32>
      tpu.vector_store %arg16[%c0_28, %c0_29], %37 {strides = array<i32>} : memref<8x128xf32, #tpu.memory_space<vmem>>, vector<8x128xf32>,
    } else {
    }
    %c0_i32_2 = arith.constant 0 : i32
    %5 = arith.cmpi eq, %arg2, %c0_i32_2 : i32
    %6 = arith.extui %5 : i1 to i32
    %c0_i32_3 = arith.constant 0 : i32
    %7 = arith.cmpi ne, %6, %c0_i32_3 : i32
    scf.if %7 {
      %cst_24 = arith.constant 0.000000e+00 : f32
      %34 = vector.broadcast %cst_24 : f32 to vector<8x128xf32>
      %c0_25 = arith.constant 0 : index
      %c0_26 = arith.constant 0 : index
      %35 = vector.load %arg17[%c0_25, %c0_26] : memref<8x128xf32, #tpu.memory_space<vmem>>, vector<8x128xf32>
      tpu.vector_store %arg17[%c0_25, %c0_26], %34 {strides = array<i32>} : memref<8x128xf32, #tpu.memory_space<vmem>>, vector<8x128xf32>,
    } else {
    }
    %c0 = arith.constant 0 : index
    %c0_4 = arith.constant 0 : index
    %8 = vector.load %arg16[%c0, %c0_4] : memref<8x128xf32, #tpu.memory_space<vmem>>, vector<8x128xf32>
    %9 = arith.truncf %8 : vector<8x128xf32> to vector<8x128xbf16>
    %c0_5 = arith.constant 0 : index
    %c0_6 = arith.constant 0 : index
    %c0_7 = arith.constant 0 : index
    %10 = vector.load %arg5[%c0_5, %c0_6, %c0_7] : memref<1x128x256xbf16, #tpu.memory_space<vmem>>, vector<1x128x256xbf16>
    %11 = vector.shape_cast %10 : vector<1x128x256xbf16> to vector<128x256xbf16>
    %cst = arith.constant dense<0.000000e+00> : vector<8x256xf32>
    %12 = tpu.matmul %9, %11, %cst {dimension_numbers = #tpu.dot_dimension_numbers<[1], [0], [0], [1], [0, 0, 1, 1], [], []>} : vector<8x128xbf16>, vector<128x256xbf16>, vector<8x256xf32> -> vector<8x256xf32>
    %c0_8 = arith.constant 0 : index
    %c0_9 = arith.constant 0 : index
    %c0_10 = arith.constant 0 : index
    %13 = vector.load %arg6[%c0_8, %c0_9, %c0_10] : memref<1x1x256xf32, #tpu.memory_space<vmem>>, vector<1x1x256xf32>
    %14 = vector.shape_cast %13 : vector<1x1x256xf32> to vector<1x256xf32>
    %15 = vector.broadcast %14 : vector<1x256xf32> to vector<8x256xf32>
    %16 = arith.addf %12, %15 : vector<8x256xf32>
    %cst_11 = arith.constant 0.000000e+00 : f32
    %17 = vector.broadcast %cst_11 : f32 to vector<8x256xf32>
    %18 = arith.maximumf %16, %17 : vector<8x256xf32>
    %c0_12 = arith.constant 0 : index
    %c0_13 = arith.constant 0 : index
    %19 = vector.load %arg17[%c0_12, %c0_13] : memref<8x128xf32, #tpu.memory_space<vmem>>, vector<8x128xf32>
    %20 = arith.truncf %18 : vector<8x256xf32> to vector<8x256xbf16>
    %c0_14 = arith.constant 0 : index
    %c0_15 = arith.constant 0 : index
    %c0_16 = arith.constant 0 : index
    %21 = vector.load %arg7[%c0_14, %c0_15, %c0_16] : memref<1x256x128xbf16, #tpu.memory_space<vmem>>, vector<1x256x128xbf16>
    %22 = vector.shape_cast %21 : vector<1x256x128xbf16> to vector<256x128xbf16>
    %cst_17 = arith.constant dense<0.000000e+00> : vector<8x128xf32>
    %23 = tpu.matmul %20, %22, %cst_17 {dimension_numbers = #tpu.dot_dimension_numbers<[1], [0], [0], [1], [0, 0, 1, 1], [], []>} : vector<8x256xbf16>, vector<256x128xbf16>, vector<8x128xf32> -> vector<8x128xf32>
    %24 = arith.addf %19, %23 : vector<8x128xf32>
    %c0_18 = arith.constant 0 : index
    %c0_19 = arith.constant 0 : index
    %25 = vector.load %arg17[%c0_18, %c0_19] : memref<8x128xf32, #tpu.memory_space<vmem>>, vector<8x128xf32>
    tpu.vector_store %arg17[%c0_18, %c0_19], %24 {strides = array<i32>} : memref<8x128xf32, #tpu.memory_space<vmem>>, vector<8x128xf32>,
    %c0_i32_20 = arith.constant 0 : i32
    %26 = arith.cmpi eq, %arg2, %c0_i32_20 : i32
    %27 = arith.extui %26 : i1 to i32
    %c0_i32_21 = arith.constant 0 : i32
    %28 = arith.cmpi ne, %27, %c0_i32_21 : i32
    scf.if %28 {
      %c0_24 = arith.constant 0 : index
      %c0_25 = arith.constant 0 : index
      %34 = vector.load %arg16[%c0_24, %c0_25] : memref<8x128xf32, #tpu.memory_space<vmem>>, vector<8x128xf32>
      %c0_26 = arith.constant 0 : index
      %c0_27 = arith.constant 0 : index
      %35 = vector.load %arg17[%c0_26, %c0_27] : memref<8x128xf32, #tpu.memory_space<vmem>>, vector<8x128xf32>
      %36 = arith.addf %34, %35 : vector<8x128xf32>
      %c0_28 = arith.constant 0 : index
      %c0_29 = arith.constant 0 : index
      %c0_30 = arith.constant 0 : index
      %37 = vector.load %arg8[%c0_28, %c0_29, %c0_30] : memref<1x1x128xf32, #tpu.memory_space<vmem>>, vector<1x1x128xf32>
      %38 = vector.shape_cast %37 : vector<1x1x128xf32> to vector<1x128xf32>
      %39 = vector.broadcast %38 : vector<1x128xf32> to vector<8x128xf32>
      %40 = arith.addf %36, %39 : vector<8x128xf32>
      %c0_31 = arith.constant 0 : index
      %c0_32 = arith.constant 0 : index
      %c0_33 = arith.constant 0 : index
      %41 = vector.load %arg9[%c0_31, %c0_32, %c0_33] : memref<1x1x128xf32, #tpu.memory_space<vmem>>, vector<1x1x128xf32>
      %42 = vector.shape_cast %41 : vector<1x1x128xf32> to vector<1x128xf32>
      %c0_34 = arith.constant 0 : index
      %c0_35 = arith.constant 0 : index
      %c0_36 = arith.constant 0 : index
      %43 = vector.load %arg10[%c0_34, %c0_35, %c0_36] : memref<1x1x128xf32, #tpu.memory_space<vmem>>, vector<1x1x128xf32>
      %44 = vector.shape_cast %43 : vector<1x1x128xf32> to vector<1x128xf32>
      %cst_37 = arith.constant dense<0.000000e+00> : vector<8xf32>
      %45 = vector.multi_reduction <add>, %40, %cst_37 [1] : vector<8x128xf32> to vector<8xf32>
      %46 = vector.shape_cast %45 : vector<8xf32> to vector<8x1xf32>
      %cst_38 = arith.constant 1.280000e+02 : f32
      %47 = vector.broadcast %cst_38 : f32 to vector<8x1xf32>
      %48 = arith.divf %46, %47 : vector<8x1xf32>
      %49 = vector.broadcast %48 : vector<8x1xf32> to vector<8x128xf32>
      %50 = arith.subf %40, %49 : vector<8x128xf32>
      %51 = arith.mulf %50, %50 : vector<8x128xf32>
      %cst_39 = arith.constant dense<0.000000e+00> : vector<8xf32>
      %52 = vector.multi_reduction <add>, %51, %cst_39 [1] : vector<8x128xf32> to vector<8xf32>
      %53 = vector.shape_cast %52 : vector<8xf32> to vector<8x1xf32>
      %cst_40 = arith.constant 1.280000e+02 : f32
      %54 = vector.broadcast %cst_40 : f32 to vector<8x1xf32>
      %55 = arith.divf %53, %54 : vector<8x1xf32>
      %cst_41 = arith.constant 9.99999974E-6 : f32
      %56 = vector.broadcast %cst_41 : f32 to vector<8x1xf32>
      %57 = arith.addf %55, %56 : vector<8x1xf32>
      %58 = math.rsqrt %57 : vector<8x1xf32>
      %59 = vector.broadcast %58 : vector<8x1xf32> to vector<8x128xf32>
      %60 = arith.mulf %50, %59 : vector<8x128xf32>
      %61 = vector.broadcast %42 : vector<1x128xf32> to vector<8x128xf32>
      %62 = arith.mulf %60, %61 : vector<8x128xf32>
      %63 = vector.broadcast %44 : vector<1x128xf32> to vector<8x128xf32>
      %64 = arith.addf %62, %63 : vector<8x128xf32>
      %c0_42 = arith.constant 0 : index
      %c0_43 = arith.constant 0 : index
      %65 = vector.load %arg16[%c0_42, %c0_43] : memref<8x128xf32, #tpu.memory_space<vmem>>, vector<8x128xf32>
      tpu.vector_store %arg16[%c0_42, %c0_43], %64 {strides = array<i32>} : memref<8x128xf32, #tpu.memory_space<vmem>>, vector<8x128xf32>,
    } else {
    }
    %c1_i32 = arith.constant 1 : i32
    %29 = arith.cmpi eq, %arg1, %c1_i32 : i32
    %c0_i32_22 = arith.constant 0 : i32
    %30 = arith.cmpi eq, %arg2, %c0_i32_22 : i32
    %31 = arith.andi %29, %30 : i1
    %32 = arith.extui %31 : i1 to i32
    %c0_i32_23 = arith.constant 0 : i32
    %33 = arith.cmpi ne, %32, %c0_i32_23 : i32
    scf.if %33 {
      %c0_24 = arith.constant 0 : index
      %c0_25 = arith.constant 0 : index
      %34 = vector.load %arg16[%c0_24, %c0_25] : memref<8x128xf32, #tpu.memory_space<vmem>>, vector<8x128xf32>
      %c0_26 = arith.constant 0 : index
      %c0_27 = arith.constant 0 : index
      %35 = vector.load %arg11[%c0_26, %c0_27] : memref<1x128xf32, #tpu.memory_space<vmem>>, vector<1x128xf32>
      %c0_28 = arith.constant 0 : index
      %c0_29 = arith.constant 0 : index
      %36 = vector.load %arg12[%c0_28, %c0_29] : memref<1x128xf32, #tpu.memory_space<vmem>>, vector<1x128xf32>
      %cst_30 = arith.constant dense<0.000000e+00> : vector<8xf32>
      %37 = vector.multi_reduction <add>, %34, %cst_30 [1] : vector<8x128xf32> to vector<8xf32>
      %38 = vector.shape_cast %37 : vector<8xf32> to vector<8x1xf32>
      %cst_31 = arith.constant 1.280000e+02 : f32
      %39 = vector.broadcast %cst_31 : f32 to vector<8x1xf32>
      %40 = arith.divf %38, %39 : vector<8x1xf32>
      %41 = vector.broadcast %40 : vector<8x1xf32> to vector<8x128xf32>
      %42 = arith.subf %34, %41 : vector<8x128xf32>
      %43 = arith.mulf %42, %42 : vector<8x128xf32>
      %cst_32 = arith.constant dense<0.000000e+00> : vector<8xf32>
      %44 = vector.multi_reduction <add>, %43, %cst_32 [1] : vector<8x128xf32> to vector<8xf32>
      %45 = vector.shape_cast %44 : vector<8xf32> to vector<8x1xf32>
      %cst_33 = arith.constant 1.280000e+02 : f32
      %46 = vector.broadcast %cst_33 : f32 to vector<8x1xf32>
      %47 = arith.divf %45, %46 : vector<8x1xf32>
      %cst_34 = arith.constant 9.99999974E-6 : f32
      %48 = vector.broadcast %cst_34 : f32 to vector<8x1xf32>
      %49 = arith.addf %47, %48 : vector<8x1xf32>
      %50 = math.rsqrt %49 : vector<8x1xf32>
      %51 = vector.broadcast %50 : vector<8x1xf32> to vector<8x128xf32>
      %52 = arith.mulf %42, %51 : vector<8x128xf32>
      %53 = vector.broadcast %35 : vector<1x128xf32> to vector<8x128xf32>
      %54 = arith.mulf %52, %53 : vector<8x128xf32>
      %55 = vector.broadcast %36 : vector<1x128xf32> to vector<8x128xf32>
      %56 = arith.addf %54, %55 : vector<8x128xf32>
      %57 = arith.truncf %56 : vector<8x128xf32> to vector<8x128xbf16>
      %c0_35 = arith.constant 0 : index
      %c0_36 = arith.constant 0 : index
      %58 = vector.load %arg13[%c0_35, %c0_36] : memref<128x128xbf16, #tpu.memory_space<vmem>>, vector<128x128xbf16>
      %cst_37 = arith.constant dense<0.000000e+00> : vector<8x128xf32>
      %59 = tpu.matmul %57, %58, %cst_37 {dimension_numbers = #tpu.dot_dimension_numbers<[1], [0], [0], [1], [0, 0, 1, 1], [], []>} : vector<8x128xbf16>, vector<128x128xbf16>, vector<8x128xf32> -> vector<8x128xf32>
      %c0_38 = arith.constant 0 : index
      %c0_39 = arith.constant 0 : index
      %60 = vector.load %arg14[%c0_38, %c0_39] : memref<1x128xf32, #tpu.memory_space<vmem>>, vector<1x128xf32>
      %61 = vector.broadcast %60 : vector<1x128xf32> to vector<8x128xf32>
      %62 = arith.addf %59, %61 : vector<8x128xf32>
      %c0_40 = arith.constant 0 : index
      %c0_41 = arith.constant 0 : index
      %63 = vector.load %arg15[%c0_40, %c0_41] : memref<8x128xf32, #tpu.memory_space<vmem>>, vector<8x128xf32>
      tpu.vector_store %arg15[%c0_40, %c0_41], %62 {strides = array<i32>} : memref<8x128xf32, #tpu.memory_space<vmem>>, vector<8x128xf32>,
    } else {
    }
    return
  }
  func.func @transform_0(%arg0: i32, %arg1: i32, %arg2: i32) -> (i32, i32) {
    %c0_i32 = arith.constant 0 : i32
    %c0_i32_0 = arith.constant 0 : i32
    %c0_i32_1 = arith.constant 0 : i32
    return %c0_i32, %c0_i32_0 : i32, i32
  }
  func.func @transform_1(%arg0: i32, %arg1: i32, %arg2: i32) -> (i32, i32) {
    %c0_i32 = arith.constant 0 : i32
    %c0_i32_0 = arith.constant 0 : i32
    return %arg0, %c0_i32 : i32, i32
  }
  func.func @transform_2(%arg0: i32, %arg1: i32, %arg2: i32) -> (i32, i32, i32) {
    %c0_i32 = arith.constant 0 : i32
    %c0_i32_0 = arith.constant 0 : i32
    return %arg1, %c0_i32, %arg2 : i32, i32, i32
  }
  func.func @transform_3(%arg0: i32, %arg1: i32, %arg2: i32) -> (i32, i32, i32) {
    %c0_i32 = arith.constant 0 : i32
    %c0_i32_0 = arith.constant 0 : i32
    return %arg1, %c0_i32, %arg2 : i32, i32, i32
  }
  func.func @transform_4(%arg0: i32, %arg1: i32, %arg2: i32) -> (i32, i32, i32) {
    %c0_i32 = arith.constant 0 : i32
    %c0_i32_0 = arith.constant 0 : i32
    return %arg1, %arg2, %c0_i32 : i32, i32, i32
  }
  func.func @transform_5(%arg0: i32, %arg1: i32, %arg2: i32) -> (i32, i32, i32) {
    %c0_i32 = arith.constant 0 : i32
    %c0_i32_0 = arith.constant 0 : i32
    %c0_i32_1 = arith.constant 0 : i32
    return %arg1, %c0_i32, %c0_i32_0 : i32, i32, i32
  }
  func.func @transform_6(%arg0: i32, %arg1: i32, %arg2: i32) -> (i32, i32, i32) {
    %c0_i32 = arith.constant 0 : i32
    %c0_i32_0 = arith.constant 0 : i32
    %c0_i32_1 = arith.constant 0 : i32
    return %arg1, %c0_i32, %c0_i32_0 : i32, i32, i32
  }
  func.func @transform_7(%arg0: i32, %arg1: i32, %arg2: i32) -> (i32, i32, i32) {
    %c0_i32 = arith.constant 0 : i32
    %c0_i32_0 = arith.constant 0 : i32
    %c0_i32_1 = arith.constant 0 : i32
    return %arg1, %c0_i32, %c0_i32_0 : i32, i32, i32
  }
  func.func @transform_8(%arg0: i32, %arg1: i32, %arg2: i32) -> (i32, i32) {
    %c0_i32 = arith.constant 0 : i32
    %c0_i32_0 = arith.constant 0 : i32
    %c0_i32_1 = arith.constant 0 : i32
    return %c0_i32, %c0_i32_0 : i32, i32
  }
  func.func @transform_9(%arg0: i32, %arg1: i32, %arg2: i32) -> (i32, i32) {
    %c0_i32 = arith.constant 0 : i32
    %c0_i32_0 = arith.constant 0 : i32
    %c0_i32_1 = arith.constant 0 : i32
    return %c0_i32, %c0_i32_0 : i32, i32
  }
  func.func @transform_10(%arg0: i32, %arg1: i32, %arg2: i32) -> (i32, i32) {
    %c0_i32 = arith.constant 0 : i32
    %c0_i32_0 = arith.constant 0 : i32
    %c0_i32_1 = arith.constant 0 : i32
    return %c0_i32, %c0_i32_0 : i32, i32
  }
  func.func @transform_11(%arg0: i32, %arg1: i32, %arg2: i32) -> (i32, i32) {
    %c0_i32 = arith.constant 0 : i32
    %c0_i32_0 = arith.constant 0 : i32
    %c0_i32_1 = arith.constant 0 : i32
    return %c0_i32, %c0_i32_0 : i32, i32
  }
  func.func @transform_12(%arg0: i32, %arg1: i32, %arg2: i32) -> (i32, i32) {
    %c0_i32 = arith.constant 0 : i32
    %c0_i32_0 = arith.constant 0 : i32
    return %arg0, %c0_i32 : i32, i32
  }
}

</mosaic_0001>

<bundles_post_ra>
// kernel: mlp_forward.1
= control target key start
LH: loop header
LB: loop body
LE: loop exit
PB: predicated region body
PF: predicated region fallthrough
CT: control target
= control target key end

     0   :  { %s2870_s0 = inlined_call_operand.hbm [shape: f32[1,128], index: 0, kind: input, shape index: {}]   ;;  %s2871_s1 = inlined_call_operand.hbm [shape: f32[8,128], index: 1, kind: input, shape index: {}]   ;;  %s2872_s2 = inlined_call_operand.hbm [shape: bf16[2,128,256], index: 2, kind: input, shape index: {}]   ;;  %s2873_s3 = inlined_call_operand.hbm [shape: f32[2,1,256], index: 3, kind: input, shape index: {}]   ;;  %s2874_s4 = inlined_call_operand.hbm [shape: bf16[2,256,128], index: 4, kind: input, shape index: {}]   ;;  %s2875_s5 = inlined_call_operand.hbm [shape: f32[2,1,128], index: 5, kind: input, shape index: {}]   ;;  %s2876_s6 = inlined_call_operand.hbm [shape: f32[2,1,128], index: 6, kind: input, shape index: {}]   ;;  %s2877_s7 = inlined_call_operand.hbm [shape: f32[2,1,128], index: 7, kind: input, shape index: {}]   ;;  %s2878_s8 = inlined_call_operand.hbm [shape: f32[1,128], index: 8, kind: input, shape index: {}]   ;;  %s2879_s9 = inlined_call_operand.hbm [shape: f32[1,128], index: 9, kind: input, shape index: {}]   ;;  %s2880_s10 = inlined_call_operand.hbm [shape: bf16[128,128], index: 10, kind: input, shape index: {}]   ;;  %s2881_s11 = inlined_call_operand.hbm [shape: f32[1,128], index: 11, kind: input, shape index: {}]   ;;  %s2882_s12 = inlined_call_operand.hbm [shape: f32[8,128], index: 12, kind: output, shape index: {}]  }
   0x1   :  { %2907 = sst [smem:[#allocation36_spill]] %s2870_s0 }
   0x2   :  { %2908 = sst [smem:[#allocation37_spill]] %s2872_s2 }
   0x3   :  { %2909 = sst [smem:[#allocation38_spill]] %s2873_s3 }
   0x4   :  { %2910 = sst [smem:[#allocation39_spill]] %s2874_s4 }
   0x5   :  { %2911 = sst [smem:[#allocation40_spill]] %s2882_s12 }
   0x6   :  { %17 = vsyncpa [#allocation5], 0 }
   0x7   :  { %18 = vsyncpa [#allocation8], 0 }
   0x8   :  { %19 = vsyncpa [#allocation17], 0 }
   0x9   :  { %20 = vsyncpa [#allocation20], 0 }
   0xa   :  { %21 = vsyncpa [#allocation6], 0  ;;  %s2357_s21 = smov 0   ;;  %s2359_s22 = smov 0  }
   0xb   :  { %s2361_s23 = smov 0   ;;  %s2363_s24 = smov 0  }
   0xc   :  { %s2365_s25 = smov 0   ;;  %s2367_s26 = smov 0  }
   0xd LB: > { %2912 = sst [smem:[#allocation29_spill]] %s2254_s22  ;;  %s2386_s27 = sadd.s32 4294967295, %s2270_s26   ;;  %s2270_s26 = sphi %s2367_s26, %s27_s26   ;;  %s2266_s25 = sphi %s2365_s25, %s2968_s25   ;;  %s2262_s24 = sphi %s2363_s24, %s2967_s24   ;;  %s2258_s23 = sphi %s2361_s23, %s2965_s23   ;;  %s2254_s22 = sphi %s2359_s22, %s2964_s22   ;;  %s2250_s21 = sphi %s2357_s21, %s2963_s21  }
   0xe   : > { %2913 = sst [smem:[#allocation30_spill]] %s2258_s23  ;;  %p115_p0 = scmp.ne.s32.totalorder %s2254_s22, %s2250_s21 }
   0xf   : > { %2914 = sst [smem:[#allocation31_spill]] %s2262_s24  ;;  %p2884_p1 = scmp.eq.s32.totalorder %s2386_s27, 0 }
  0x10   : > { %2915 = sst [smem:[#allocation32_spill]] %s2270_s26  ;;  %p1476_p2 = scmp.ge.s32.totalorder %s2270_s26, 1 }
  0x11   : > { %p370_p3 = scmp.lt.s32.totalorder %s2270_s26, 3  ;;  %p2394_p4 = por %p2884_p1, %p115_p0 }
  0x12   : > { %s2272_s30 = smov [#allocation4]   ;;  %s42_s15 = sadd.s32 1, %s2266_s25 }
  0x13   : > { %s2916_s28 = scalar_select %p2394_p4, 1, 0 }
  0x14   : > { %p2398_p5 = pnand %p1476_p2, %p370_p3  ;;  %s383_s13 = sshll.u32 %s2272_s30, 4  ;;  %s384_s13 = int_to_ptr.vmem [resolvable:$true] %s383_s13 }
  0x15   : > { %2917 = sst [smem:[#allocation33_spill]] %s2916_s28  ;;  %p2412_p8 = scmp.ge.s32.totalorder %s42_s15, 2 }
  0x16   : > { %s2918_s29 = scalar_select %p2398_p5, 1, 0 }
  0x17   : > { %p1655_p6 = pneg %p2398_p5  ;;  %s2921_s0 = sld [smem:[#allocation36_spill]] }
  0x18   : > { %s2920_s17 = scalar_select %p2412_p8, 1, 0 }
  0x19   : > { %p2406_p7 = pnand %p1655_p6, %p2884_p1 }
  0x1b   : > { %s2919_s14 = scalar_select %p2406_p7, 1, 0 }
  0x1c   : > { %p2424_p10 = pneg %p2406_p7 }
  0x1d   : > { %s1822_s20 = scalar_lea.hbm %s2921_s0, 16 }
  0x1e   : > { %p1823_p9 = scmp.ne.s32.totalorder %s2921_s0, %s1822_s20  ;;  %p1829_p13 = scmp.lt.u32.totalorder %s1822_s20, %s2921_s0 }
  0x1f   : > { %s2922_s12 = scalar_select %p2424_p10, 1, 0 }
  0x20   : > { %p1825_p11 = pnand %p2424_p10, %p1823_p9 }
  0x22   : > { %p1826_p12 = pneg %p1825_p11 }
  0x24   : > { %p1831_p0 = pnand %p1829_p13, %p1826_p12 }
  0x26   : > { %1834 = shalt.err (!%p1831_p0)
}
  0x27   : > { %s1835_s18 = scalar_lea.vmem %s384_s13, 16  ;;  %s1842_s19 = scalar_lea.vmem %s384_s13, 32 }
  0x28   : > { %p1836_p2 = scmp.ne.s32.totalorder %s384_s13, %s1835_s18  ;;  %p1843_p1 = scmp.lt.s32.totalorder %s384_s13, %s384_s13 }
  0x29   : > { %p1844_p4 = scmp.lt.s32.totalorder %s1842_s19, %s1835_s18 }
  0x2a   : > { %p1838_p3 = pnand %p1836_p2, %p2424_p10 }
  0x2b   : > { %p1845_p5 = por %p1844_p4, %p1843_p1 }
  0x2c   : > { %p1839_p6 = pneg %p1838_p3 }
  0x2e   : > { %p1846_p8 = pnand %p1845_p5, %p1839_p6 }
  0x30   : > { %1849 = shalt.err (!%p1846_p8)
}
  0x31   : > { %1658 = dma.hbm_to_vmem [thread:$0]  (!%p2406_p7), %s2921_s0, 16, %s384_s13, [#allocation5]  }
  0x32   : > { %p2923_p1 = scmp.ne.s32.totalorder %s2920_s17, 0  ;;  %p109_p4 = scmp.ne.s32.totalorder %s2258_s23, %s2254_s22 }
  0x33   : > { %p110_p5 = scmp.eq.s32.totalorder %s2270_s26, 0  ;;  %p1699_p8 = scmp.lt.s32.totalorder %s2270_s26, 2 }
  0x34   : > { %s2970_s15 = smov (%p2923_p1, %s42_s15), 0  ;;  %s453_s16 = sand.u32 1, %s2270_s26  }
  0x35   : > { %2924 = sst [smem:[#allocation34_spill]] %s2970_s15  ;;  %s97_s24 = ssub.s32 %s2266_s25, %s2970_s15 }
  0x36   : > { %p100_p9 = scmp.eq.s32.totalorder %s97_s24, 0  ;;  %p111_p11 = por %p110_p5, %p109_p4 }
  0x37   : > { %s2452_s20 = sand.u32 1, %s2258_s23   ;;  %s2925_s18 = sadd.s32 1, %s2258_s23 }
  0x38   : > { %s2457_s19 = scalar_select %p100_p9, %s2258_s23, %s2925_s18  }
  0x39   : > { %s2889_s13 = sshll.u32 %s2452_s20, 7  ;;  %s2890_s17 = sshll.u32 %s2266_s25, 11 }
  0x3a   : > { %2926 = sst [smem:[#allocation35_spill]] %s2457_s19  ;;  %s457_s24 = scalar_lea.vmem [#allocation9], %s2889_s13 }
  0x3b   : > { %s2927_s2 = sld [smem:[#allocation37_spill]]  ;;  %s466_s15 = sshll.u32 %s457_s24, 4  ;;  %s2470_s15 = int_to_ptr.vmem [resolvable:$true] %s466_s15 }
  0x3c   : > { %p2472_p12 = pnand %p1699_p8, %p111_p11  ;;  %s2477_s23 = scalar_lea.sflag [#allocation5], %s453_s16 }
  0x3e   : > { %s2928_s18 = scalar_select %p2472_p12, 1, 0 }
  0x3f   : > { %p2483_p0 = pneg %p2472_p12 }
  0x41   : > { %s2466_s0 = scalar_lea.hbm %s2927_s2, %s2890_s17  ;;  %s1855_s17 = scalar_lea.hbm %s2927_s2, 4096 }
  0x42   : > { %s1850_s21 = scalar_lea.hbm %s2466_s0, 2048  ;;  %p1856_p6 = scmp.lt.u32.totalorder %s2466_s0, %s2927_s2 }
  0x43   : > { %p1851_p13 = scmp.ne.s32.totalorder %s2466_s0, %s1850_s21  ;;  %p1857_p1 = scmp.lt.u32.totalorder %s1855_s17, %s1850_s21 }
  0x44   : > { %s2929_s30 = scalar_select %p2483_p0, 1, 0 }
  0x45   : > { %p1853_p2 = pnand %p2483_p0, %p1851_p13  ;;  %p1858_p4 = por %p1857_p1, %p1856_p6 }
  0x46   : > { %p1859_p5 = scmp.lt.u32.totalorder %s1850_s21, %s2466_s0 }
  0x47   : > { %p1854_p3 = pneg %p1853_p2 }
  0x48   : > { %p1860_p8 = por %p1859_p5, %p1858_p4 }
  0x4a   : > { %p1861_p9 = pnand %p1860_p8, %p1854_p3 }
  0x4c   : > { %1864 = shalt.err (!%p1861_p9)
}
  0x4d   : > { %s1865_s16 = scalar_lea.vmem %s2470_s15, 2048  ;;  %s2273_s13 = smov [#allocation9]  }
  0x4e   : > { %p1866_p11 = scmp.ne.s32.totalorder %s2470_s15, %s1865_s16  ;;  %s1870_s24 = sshll.u32 %s2273_s13, 4  ;;  %s1871_s24 = int_to_ptr.vmem [resolvable:$false] %s1870_s24 }
  0x4f   : > { %s1872_s26 = scalar_lea.vmem %s1871_s24, 4096  ;;  %p1873_p7 = scmp.lt.s32.totalorder %s2470_s15, %s1871_s24 }
  0x50   : > { %p1868_p13 = pnand %p1866_p11, %p2483_p0  ;;  %p1874_p10 = scmp.lt.s32.totalorder %s1872_s26, %s1865_s16 }
  0x52   : > { %p1869_p2 = pneg %p1868_p13  ;;  %p1875_p6 = por %p1874_p10, %p1873_p7 }
  0x54   : > { %p1876_p1 = pnand %p1875_p6, %p1869_p2 }
  0x56   : > { %1879 = shalt.err (!%p1876_p1)
}
  0x57   : > { %s2274_s28 = smov 128   ;;  %s2275_s17 = smov 8  }
  0x58   : > { %1677 = dma.hbm_to_vmem [thread:$0]  (!%p2472_p12), %s2466_s0, 2048, %s2470_s15, %s2477_s23, %s2274_s28, %s2274_s28, %s2275_s17  }
  0x59   : > { %s1560_s21 = sshll.u32 %s2266_s25, 5  ;;  %s2930_s3 = sld [smem:[#allocation38_spill]] }
  0x5a   : > { %s2931_s16 = sshll.u32 %s2452_s20, 1 }
  0x5b   : > { %s480_s26 = scalar_lea.vmem [#allocation10], %s2931_s16 }
  0x5c   : > { %s490_s2 = sshll.u32 %s480_s26, 4  ;;  %s491_s2 = int_to_ptr.vmem [resolvable:$true] %s490_s2 }
  0x5f   : > { %s2511_s24 = scalar_lea.hbm %s2930_s3, %s1560_s21  ;;  %s1885_s28 = scalar_lea.hbm %s2930_s3, 64 }
  0x60   : > { %s1880_s22 = scalar_lea.hbm %s2511_s24, 32  ;;  %p1886_p4 = scmp.lt.u32.totalorder %s2511_s24, %s2930_s3 }
  0x61   : > { %p1881_p7 = scmp.ne.s32.totalorder %s2511_s24, %s1880_s22  ;;  %p1887_p5 = scmp.lt.u32.totalorder %s1885_s28, %s1880_s22 }
  0x62   : > { %p1889_p9 = scmp.lt.u32.totalorder %s1880_s22, %s2511_s24 }
  0x63   : > { %p1883_p10 = pnand %p1881_p7, %p2483_p0  ;;  %p1888_p8 = por %p1887_p5, %p1886_p4 }
  0x65   : > { %p1884_p3 = pneg %p1883_p10  ;;  %p1890_p11 = por %p1889_p9, %p1888_p8 }
  0x67   : > { %p1891_p13 = pnand %p1890_p11, %p1884_p3 }
  0x69   : > { %1894 = shalt.err (!%p1891_p13)
}
  0x6a   : > { %s1895_s21 = scalar_lea.vmem %s491_s2, 32  ;;  %s2276_s13 = smov [#allocation10]  }
  0x6b   : > { %p1896_p2 = scmp.ne.s32.totalorder %s491_s2, %s1895_s21  ;;  %s1900_s16 = sshll.u32 %s2276_s13, 4  ;;  %s1901_s16 = int_to_ptr.vmem [resolvable:$false] %s1900_s16 }
  0x6c   : > { %s1902_s26 = scalar_lea.vmem %s1901_s16, 64  ;;  %p1903_p7 = scmp.lt.s32.totalorder %s491_s2, %s1901_s16 }
  0x6d   : > { %p1898_p6 = pnand %p1896_p2, %p2483_p0  ;;  %p1904_p10 = scmp.lt.s32.totalorder %s1902_s26, %s1895_s21 }
  0x6f   : > { %p1899_p1 = pneg %p1898_p6  ;;  %p1905_p12 = por %p1904_p10, %p1903_p7 }
  0x71   : > { %p1906_p4 = pnand %p1905_p12, %p1899_p1 }
  0x73   : > { %1909 = shalt.err (!%p1906_p4)
}
  0x74   : > { %p2932_p5 = scmp.ne.s32.totalorder %s2928_s18, 0  ;;  %s2933_s22 = sshll.u32 %s2266_s25, 11 }
  0x75   : > { %s2934_s4 = sld [smem:[#allocation39_spill]]  ;;  %s2935_s19 = sshll.u32 %s2452_s20, 7 }
  0x76   : > { %1680 = dma.hbm_to_vmem [thread:$0]  (!%p2932_p5), %s2511_s24, 32, %s491_s2, %s2477_s23  }
  0x77   : > { %s501_s17 = scalar_lea.vmem [#allocation11], %s2935_s19 }
  0x78   : > { %s510_s21 = sshll.u32 %s501_s17, 4  ;;  %s2542_s21 = int_to_ptr.vmem [resolvable:$true] %s510_s21 }
  0x7b   : > { %s2538_s28 = scalar_lea.hbm %s2934_s4, %s2933_s22  ;;  %s1915_s16 = scalar_lea.hbm %s2934_s4, 4096 }
  0x7c   : > { %s1910_s13 = scalar_lea.hbm %s2538_s28, 2048  ;;  %p1916_p9 = scmp.lt.u32.totalorder %s2538_s28, %s2934_s4 }
  0x7d   : > { %p1911_p12 = scmp.ne.s32.totalorder %s2538_s28, %s1910_s13  ;;  %p1917_p11 = scmp.lt.u32.totalorder %s1915_s16, %s1910_s13 }
  0x7e   : > { %p1919_p2 = scmp.lt.u32.totalorder %s1910_s13, %s2538_s28 }
  0x7f   : > { %p1913_p3 = pnand %p1911_p12, %p2483_p0  ;;  %p1918_p13 = por %p1917_p11, %p1916_p9 }
  0x81   : > { %p1914_p8 = pneg %p1913_p3  ;;  %p1920_p6 = por %p1919_p2, %p1918_p13 }
  0x83   : > { %p1921_p1 = pnand %p1920_p6, %p1914_p8 }
  0x85   : > { %1924 = shalt.err (!%p1921_p1)
}
  0x86   : > { %s1925_s0 = scalar_lea.vmem %s2542_s21, 2048  ;;  %s2277_s15 = smov [#allocation11]  }
  0x87   : > { %p1926_p7 = scmp.ne.s32.totalorder %s2542_s21, %s1925_s0  ;;  %s1930_s19 = sshll.u32 %s2277_s15, 4  ;;  %s1931_s19 = int_to_ptr.vmem [resolvable:$false] %s1930_s19 }
  0x88   : > { %s1932_s17 = scalar_lea.vmem %s1931_s19, 4096  ;;  %p1933_p12 = scmp.lt.s32.totalorder %s2542_s21, %s1931_s19 }
  0x89   : > { %p1928_p10 = pnand %p1926_p7, %p2483_p0  ;;  %p1934_p3 = scmp.lt.s32.totalorder %s1932_s17, %s1925_s0 }
  0x8b   : > { %p1929_p4 = pneg %p1928_p10  ;;  %p1935_p9 = por %p1934_p3, %p1933_p12 }
  0x8d   : > { %p1936_p11 = pnand %p1935_p9, %p1929_p4 }
  0x8f   : > { %1939 = shalt.err (!%p1936_p11)
}
  0x90   : > { %s2902_s13 = smov 64   ;;  %s2904_s2 = smov 4  }
  0x91   : > { %1683 = dma.hbm_to_vmem [thread:$0]  (!%p2932_p5), %s2538_s28, 2048, %s2542_s21, %s2477_s23, %s2902_s13, %s2902_s13, %s2904_s2  }
  0x92   : > { %s2570_s24 = sshll.u32 %s2266_s25, 4  ;;  %s523_s16 = scalar_lea.vmem [#allocation12], %s2452_s20 }
  0x93   : > { %s530_s26 = sshll.u32 %s523_s16, 4  ;;  %s528_s15 = scalar_lea.hbm %s2875_s5, %s2570_s24  ;;  %s531_s26 = int_to_ptr.vmem [resolvable:$true] %s530_s26 }
  0x94   : > { %s1940_s19 = scalar_lea.hbm %s528_s15, 16  ;;  %s1945_s4 = scalar_lea.hbm %s2875_s5, 32 }
  0x95   : > { %p1941_p8 = scmp.ne.s32.totalorder %s528_s15, %s1940_s19  ;;  %p1946_p6 = scmp.lt.u32.totalorder %s528_s15, %s2875_s5 }
  0x96   : > { %p1947_p1 = scmp.lt.u32.totalorder %s1945_s4, %s1940_s19  ;;  %p1949_p10 = scmp.lt.u32.totalorder %s1940_s19, %s528_s15 }
  0x97   : > { %p1943_p13 = pnand %p1941_p8, %p2483_p0 }
  0x98   : > { %p1948_p7 = por %p1947_p1, %p1946_p6 }
  0x99   : > { %p1944_p2 = pneg %p1943_p13 }
  0x9a   : > { %p1950_p4 = por %p1949_p10, %p1948_p7 }
  0x9c   : > { %p1951_p12 = pnand %p1950_p4, %p1944_p2 }
  0x9e   : > { %1954 = shalt.err (!%p1951_p12)
}
  0x9f   : > { %s1955_s16 = scalar_lea.vmem %s531_s26, 16  ;;  %s2280_s22 = smov [#allocation12]  }
  0xa0   : > { %p1956_p3 = scmp.ne.s32.totalorder %s531_s26, %s1955_s16  ;;  %s1960_s0 = sshll.u32 %s2280_s22, 4  ;;  %s1961_s0 = int_to_ptr.vmem [resolvable:$false] %s1960_s0 }
  0xa1   : > { %s1962_s3 = scalar_lea.vmem %s1961_s0, 32  ;;  %p1963_p8 = scmp.lt.s32.totalorder %s531_s26, %s1961_s0 }
  0xa2   : > { %p1958_p9 = pnand %p1956_p3, %p2483_p0  ;;  %p1964_p13 = scmp.lt.s32.totalorder %s1962_s3, %s1955_s16 }
  0xa4   : > { %p1959_p11 = pneg %p1958_p9  ;;  %p1965_p5 = por %p1964_p13, %p1963_p8 }
  0xa6   : > { %p1966_p1 = pnand %p1965_p5, %p1959_p11 }
  0xa8   : > { %1969 = shalt.err (!%p1966_p1)
}
  0xa9   : > { %p2936_p6 = scmp.ne.s32.totalorder %s2928_s18, 0  ;;  %s2281_s4 = smov [#allocation7]  }
  0xaa   : > { %s396_s19 = sshll.u32 %s2281_s4, 4  ;;  %s2282_s17 = smov [#allocation16]   ;;  %s397_s19 = int_to_ptr.vmem [resolvable:$true] %s396_s19 }
  0xab   : > { %1686 = dma.hbm_to_vmem [thread:$0]  (!%p2936_p6), %s528_s15, 16, %s531_s26, %s2477_s23  }
  0xac   : > { %s418_s28 = sshll.u32 %s2282_s17, 4  ;;  %s1970_s0 = scalar_lea.hbm %s2871_s1, 128  ;;  %s2590_s28 = int_to_ptr.vmem [resolvable:$true] %s418_s28 }
  0xad   : > { %p1971_p5 = scmp.ne.s32.totalorder %s2871_s1, %s1970_s0  ;;  %p2937_p2 = scmp.ne.s32.totalorder %s2922_s12, 0 }
  0xae   : > { %p1977_p4 = scmp.lt.u32.totalorder %s1970_s0, %s2871_s1 }
  0xaf   : > { %p1973_p7 = pnand %p1971_p5, %p2937_p2 }
  0xb1   : > { %p1974_p10 = pneg %p1973_p7 }
  0xb3   : > { %p1979_p12 = pnand %p1977_p4, %p1974_p10 }
  0xb5   : > { %1982 = shalt.err (!%p1979_p12)
}
  0xb6   : > { %s1983_s15 = scalar_lea.vmem %s397_s19, 128  ;;  %p1991_p8 = scmp.lt.s32.totalorder %s397_s19, %s397_s19 }
  0xb7   : > { %p1984_p3 = scmp.ne.s32.totalorder %s397_s19, %s1983_s15  ;;  %p1992_p13 = scmp.lt.s32.totalorder %s1983_s15, %s1983_s15 }
  0xb9   : > { %p1986_p9 = pnand %p1984_p3, %p2937_p2  ;;  %p1993_p1 = por %p1992_p13, %p1991_p8 }
  0xbb   : > { %p1987_p11 = pneg %p1986_p9 }
  0xbd   : > { %p1994_p6 = pnand %p1993_p1, %p1987_p11 }
  0xbf   : > { %1997 = shalt.err (!%p1994_p6)
}
  0xc0   : > { %p2938_p5 = scmp.ne.s32.totalorder %s2919_s14, 0  ;;  %s1998_s22 = scalar_lea.hbm %s2879_s9, 16 }
  0xc1   : > { %p1999_p7 = scmp.ne.s32.totalorder %s2879_s9, %s1998_s22  ;;  %p2005_p6 = scmp.lt.u32.totalorder %s1998_s22, %s2879_s9 }
  0xc2   : > { %1661 = dma.hbm_to_vmem [thread:$0]  (!%p2938_p5), %s2871_s1, 128, %s397_s19, [#allocation8]  }
  0xc3   : > { %p2001_p10 = pnand %p1999_p7, %p2937_p2 }
  0xc5   : > { %p2002_p4 = pneg %p2001_p10 }
  0xc7   : > { %p2007_p12 = pnand %p2005_p6, %p2002_p4 }
  0xc9   : > { %2010 = shalt.err (!%p2007_p12)
}
  0xca   : > { %s2011_s19 = scalar_lea.vmem %s2590_s28, 16  ;;  %s2018_s15 = scalar_lea.vmem %s2590_s28, 32 }
  0xcb   : > { %p2012_p3 = scmp.ne.s32.totalorder %s2590_s28, %s2011_s19  ;;  %p2019_p8 = scmp.lt.s32.totalorder %s2590_s28, %s2590_s28 }
  0xcc   : > { %p2020_p13 = scmp.lt.s32.totalorder %s2018_s15, %s2011_s19 }
  0xcd   : > { %p2014_p9 = pnand %p2012_p3, %p2937_p2 }
  0xce   : > { %p2021_p1 = por %p2020_p13, %p2019_p8 }
  0xcf   : > { %p2015_p11 = pneg %p2014_p9 }
  0xd1   : > { %p2022_p7 = pnand %p2021_p1, %p2015_p11 }
  0xd3   : > { %2025 = shalt.err (!%p2022_p7)
}
  0xd4   : > { %1667 = dma.hbm_to_vmem [thread:$0]  (!%p2938_p5), %s2879_s9, 16, %s2590_s28, [#allocation17]  }
  0xd5   : > { %s2638_s22 = scalar_lea.hbm %s2876_s6, %s2570_s24  ;;  %s540_s0 = scalar_lea.vmem [#allocation13], %s2452_s20 }
  0xd6   : > { %s547_s16 = sshll.u32 %s540_s0, 4  ;;  %s2283_s3 = smov [#allocation15]   ;;  %s2641_s16 = int_to_ptr.vmem [resolvable:$true] %s547_s16 }
  0xd7   : > { %s407_s26 = sshll.u32 %s2283_s3, 4  ;;  %s2026_s19 = scalar_lea.hbm %s2638_s22, 16  ;;  %s408_s26 = int_to_ptr.vmem [resolvable:$true] %s407_s26 }
  0xd8   : > { %p2027_p10 = scmp.ne.s32.totalorder %s2638_s22, %s2026_s19  ;;  %s2031_s4 = scalar_lea.hbm %s2876_s6, 32 }
  0xd9   : > { %p2032_p12 = scmp.lt.u32.totalorder %s2638_s22, %s2876_s6  ;;  %p2033_p3 = scmp.lt.u32.totalorder %s2031_s4, %s2026_s19 }
  0xda   : > { %p2029_p4 = pnand %p2027_p10, %p2483_p0  ;;  %p2035_p11 = scmp.lt.u32.totalorder %s2026_s19, %s2638_s22 }
  0xdb   : > { %p2034_p9 = por %p2033_p3, %p2032_p12 }
  0xdc   : > { %p2030_p6 = pneg %p2029_p4 }
  0xdd   : > { %p2036_p8 = por %p2035_p11, %p2034_p9 }
  0xdf   : > { %p2037_p13 = pnand %p2036_p8, %p2030_p6 }
  0xe1   : > { %2040 = shalt.err (!%p2037_p13)
}
  0xe2   : > { %s2041_s21 = scalar_lea.vmem %s2641_s16, 16  ;;  %s2284_s0 = smov [#allocation13]  }
  0xe3   : > { %p2042_p1 = scmp.ne.s32.totalorder %s2641_s16, %s2041_s21  ;;  %s2046_s3 = sshll.u32 %s2284_s0, 4  ;;  %s2047_s3 = int_to_ptr.vmem [resolvable:$false] %s2046_s3 }
  0xe4   : > { %s2048_s28 = scalar_lea.vmem %s2047_s3, 32  ;;  %p2049_p4 = scmp.lt.s32.totalorder %s2641_s16, %s2047_s3 }
  0xe5   : > { %p2044_p7 = pnand %p2042_p1, %p2483_p0  ;;  %p2050_p5 = scmp.lt.s32.totalorder %s2048_s28, %s2041_s21 }
  0xe7   : > { %p2045_p10 = pneg %p2044_p7  ;;  %p2051_p12 = por %p2050_p5, %p2049_p4 }
  0xe9   : > { %p2052_p3 = pnand %p2051_p12, %p2045_p10 }
  0xeb   : > { %2055 = shalt.err (!%p2052_p3)
}
  0xec   : > { %p2939_p6 = scmp.ne.s32.totalorder %s2928_s18, 0  ;;  %s2056_s4 = scalar_lea.hbm %s2878_s8, 16 }
  0xed   : > { %p2057_p9 = scmp.ne.s32.totalorder %s2878_s8, %s2056_s4  ;;  %p2063_p8 = scmp.lt.u32.totalorder %s2056_s4, %s2878_s8 }
  0xee   : > { %1689 = dma.hbm_to_vmem [thread:$0]  (!%p2939_p6), %s2638_s22, 16, %s2641_s16, %s2477_s23  }
  0xef   : > { %p2059_p5 = pnand %p2057_p9, %p2937_p2 }
  0xf1   : > { %p2060_p11 = pneg %p2059_p5 }
  0xf3   : > { %p2065_p13 = pnand %p2063_p8, %p2060_p11 }
  0xf5   : > { %2068 = shalt.err (!%p2065_p13)
}
  0xf6   : > { %s2069_s3 = scalar_lea.vmem %s408_s26, 16  ;;  %s2076_s22 = scalar_lea.vmem %s408_s26, 32 }
  0xf7   : > { %p2070_p1 = scmp.ne.s32.totalorder %s408_s26, %s2069_s3  ;;  %p2077_p4 = scmp.lt.s32.totalorder %s408_s26, %s408_s26 }
  0xf8   : > { %p2078_p12 = scmp.lt.s32.totalorder %s2076_s22, %s2069_s3 }
  0xf9   : > { %p2072_p7 = pnand %p2070_p1, %p2937_p2 }
  0xfa   : > { %p2079_p3 = por %p2078_p12, %p2077_p4 }
  0xfb   : > { %p2073_p10 = pneg %p2072_p7 }
  0xfd   : > { %p2080_p6 = pnand %p2079_p3, %p2073_p10 }
  0xff   : > { %2083 = shalt.err (!%p2080_p6)
}
 0x100   : > { %p2940_p9 = scmp.ne.s32.totalorder %s2919_s14, 0  ;;  %s2285_s19 = smov [#allocation18]  }
 0x101   : > { %s428_s15 = sshll.u32 %s2285_s19, 4  ;;  %s2286_s4 = smov [#allocation19]   ;;  %s429_s15 = int_to_ptr.vmem [resolvable:$true] %s428_s15 }
 0x102   : > { %1664 = dma.hbm_to_vmem [thread:$0]  (!%p2940_p9), %s2878_s8, 16, %s408_s26, [#allocation8]  }
 0x103   : > { %s442_s17 = sshll.u32 %s2286_s4, 4  ;;  %s2084_s0 = scalar_lea.hbm %s2880_s10, 1024  ;;  %s443_s17 = int_to_ptr.vmem [resolvable:$true] %s442_s17 }
 0x104   : > { %p2085_p6 = scmp.ne.s32.totalorder %s2880_s10, %s2084_s0  ;;  %p2091_p8 = scmp.lt.u32.totalorder %s2084_s0, %s2880_s10 }
 0x106   : > { %p2087_p5 = pnand %p2085_p6, %p2937_p2 }
 0x108   : > { %p2088_p11 = pneg %p2087_p5 }
 0x10a   : > { %p2093_p13 = pnand %p2091_p8, %p2088_p11 }
 0x10c   : > { %2096 = shalt.err (!%p2093_p13)
}
 0x10d   : > { %s2097_s26 = scalar_lea.vmem %s429_s15, 1024  ;;  %p2105_p4 = scmp.lt.s32.totalorder %s429_s15, %s429_s15 }
 0x10e   : > { %p2098_p1 = scmp.ne.s32.totalorder %s429_s15, %s2097_s26  ;;  %p2106_p12 = scmp.lt.s32.totalorder %s2097_s26, %s2097_s26 }
 0x110   : > { %p2100_p7 = pnand %p2098_p1, %p2937_p2  ;;  %p2107_p3 = por %p2106_p12, %p2105_p4 }
 0x112   : > { %p2101_p10 = pneg %p2100_p7 }
 0x114   : > { %p2108_p0 = pnand %p2107_p3, %p2101_p10 }
 0x116   : > { %2111 = shalt.err (!%p2108_p0)
}
 0x117   : > { %s2941_s28 = smov 4   ;;  %s2942_s19 = smov 64  }
 0x118   : > { %1670 = dma.hbm_to_vmem [thread:$0]  (!%p2940_p9), %s2880_s10, 1024, %s429_s15, [#allocation17], %s2942_s19, %s2942_s19, %s2941_s28  }
 0x119   : > { %s2112_s0 = scalar_lea.hbm %s2881_s11, 16 }
 0x11a   : > { %p2113_p6 = scmp.ne.s32.totalorder %s2881_s11, %s2112_s0  ;;  %p2119_p11 = scmp.lt.u32.totalorder %s2112_s0, %s2881_s11 }
 0x11c   : > { %p2115_p0 = pnand %p2113_p6, %p2937_p2 }
 0x11e   : > { %p2116_p5 = pneg %p2115_p0 }
 0x120   : > { %p2121_p8 = pnand %p2119_p11, %p2116_p5 }
 0x122   : > { %2124 = shalt.err (!%p2121_p8)
}
 0x123   : > { %s2125_s2 = scalar_lea.vmem %s443_s17, 16  ;;  %s2132_s15 = scalar_lea.vmem %s443_s17, 32 }
 0x124   : > { %p2126_p13 = scmp.ne.s32.totalorder %s443_s17, %s2125_s2  ;;  %p2133_p10 = scmp.lt.s32.totalorder %s443_s17, %s443_s17 }
 0x125   : > { %p2134_p4 = scmp.lt.s32.totalorder %s2132_s15, %s2125_s2 }
 0x126   : > { %p2128_p1 = pnand %p2126_p13, %p2937_p2 }
 0x127   : > { %p2135_p12 = por %p2134_p4, %p2133_p10 }
 0x128   : > { %p2129_p7 = pneg %p2128_p1 }
 0x12a   : > { %p2136_p3 = pnand %p2135_p12, %p2129_p7 }
 0x12c   : > { %2139 = shalt.err (!%p2136_p3)
}
 0x12d   : > { %1673 = dma.hbm_to_vmem [thread:$0]  (!%p2940_p9), %s2881_s11, 16, %s443_s17, [#allocation20]  }
 0x12e   : > { %s2726_s12 = scalar_lea.hbm %s2877_s7, %s2570_s24  ;;  %s557_s21 = scalar_lea.vmem [#allocation14], %s2452_s20 }
 0x12f   : > { %s564_s0 = sshll.u32 %s557_s21, 4  ;;  %s2140_s14 = scalar_lea.hbm %s2726_s12, 16  ;;  %s565_s0 = int_to_ptr.vmem [resolvable:$true] %s564_s0 }
 0x130   : > { %p2141_p2 = scmp.ne.s32.totalorder %s2726_s12, %s2140_s14  ;;  %p2943_p6 = scmp.ne.s32.totalorder %s2929_s30, 0 }
 0x131   : > { %s2145_s17 = scalar_lea.hbm %s2877_s7, 32  ;;  %p2146_p9 = scmp.lt.u32.totalorder %s2726_s12, %s2877_s7 }
 0x132   : > { %p2143_p0 = pnand %p2141_p2, %p2943_p6  ;;  %p2147_p11 = scmp.lt.u32.totalorder %s2145_s17, %s2140_s14 }
 0x133   : > { %p2149_p13 = scmp.lt.u32.totalorder %s2140_s14, %s2726_s12 }
 0x134   : > { %p2144_p5 = pneg %p2143_p0  ;;  %p2148_p8 = por %p2147_p11, %p2146_p9 }
 0x136   : > { %p2150_p1 = por %p2149_p13, %p2148_p8 }
 0x138   : > { %p2151_p7 = pnand %p2150_p1, %p2144_p5 }
 0x13a   : > { %2154 = shalt.err (!%p2151_p7)
}
 0x13b   : > { %s2155_s20 = scalar_lea.vmem %s565_s0, 16  ;;  %s2287_s24 = smov [#allocation14]  }
 0x13c   : > { %p2156_p10 = scmp.ne.s32.totalorder %s565_s0, %s2155_s20  ;;  %s2160_s2 = sshll.u32 %s2287_s24, 4  ;;  %s2161_s2 = int_to_ptr.vmem [resolvable:$false] %s2160_s2 }
 0x13d   : > { %s2162_s15 = scalar_lea.vmem %s2161_s2, 32  ;;  %p2163_p3 = scmp.lt.s32.totalorder %s565_s0, %s2161_s2 }
 0x13e   : > { %p2158_p4 = pnand %p2156_p10, %p2943_p6  ;;  %p2164_p2 = scmp.lt.s32.totalorder %s2162_s15, %s2155_s20 }
 0x140   : > { %p2159_p12 = pneg %p2158_p4  ;;  %p2165_p0 = por %p2164_p2, %p2163_p3 }
 0x142   : > { %p2166_p9 = pnand %p2165_p0, %p2159_p12 }
 0x144   : > { %2169 = shalt.err (!%p2166_p9)
}
 0x145   : > { %p2944_p11 = scmp.ne.s32.totalorder %s2928_s18, 0  ;;  %p2945_p5 = scmp.ne.s32.totalorder %s2918_s29, 0 }
 0x146   : > { %p2946_p6 = scmp.eq.s32.totalorder (!%p2945_p5), %s2386_s27, 0 }
 0x147   : > { %1692 = dma.hbm_to_vmem [thread:$0]  (!%p2944_p11), %s2726_s12, 16, %s565_s0, %s2477_s23  }
 0x148   : > { %573 = sbr.rel (%p2945_p5) target bundleno = 1726 (0x6be), region = 68 }
 0x14f   : > { %2221 = dma.done.wait (%p2946_p6), [#allocation5], 16   ;;  %p2947_p8 = pmov %p2946_p6 }
 0x150   : > { %p2948_p13 = pmov %p2946_p6 }
 0x151   : > { %2223 = vsyncadd (%p2947_p8), [#allocation5], 4294967280 }
 0x152   : > { %2225 = dma.done.wait (%p2948_p13), [#allocation8], 128   ;;  %p2949_p1 = pmov %p2946_p6 }
 0x153   : > { %s2950_s18 = sld [smem:[#allocation29_spill]]  ;;  %s2951_s30 = sld [smem:[#allocation33_spill]] }
 0x154   : > { %2227 = vsyncadd (%p2949_p1), [#allocation8], 4294967168  ;;  %s583_s28 = sand.u32 1, %s2386_s27  }
 0x155   : > { %s584_s19 = scalar_lea.sflag [#allocation5], %s583_s28 }
 0x159   : > { %s2759_s23 = sand.u32 1, %s2950_s18   ;;  %p2952_p7 = scmp.ne.s32.totalorder %s2951_s30, 0 }
 0x15a   : > { %s1499_s29 = sshll.u32 %s2759_s23, 7 }
 0x15b   : > { %s2762_s4 = scalar_lea.vmem [#allocation9], %s1499_s29 }
 0x15c   : > { %2229 = dma.done.wait (%p2952_p7), %s584_s19, 4176  }
 0x15d   : > { %2231 = vsyncadd (%p2952_p7), %s584_s19, 4294963120  ;;  %s1500_s13 = sshll.u32 %s2759_s23, 1  ;;  %s2771_s21 = scalar_lea.vmem [#allocation11], %s1499_s29 }
 0x15e   : > { %s2769_s12 = scalar_lea.vmem [#allocation10], %s1500_s13  ;;  %s613_s0 = scalar_lea.vmem [#allocation12], %s2759_s23 }
 0x15f   : > { %s621_s14 = scalar_lea.vmem [#allocation13], %s2759_s23  ;;  %s629_s3 = scalar_lea.vmem [#allocation14], %s2759_s23 }
 0x160   : > { %p2953_p10 = pmov %p2949_p1 }
 0x161   : > { %p2954_p4 = pmov %p2949_p1 }
 0x162   : > { %2233 = dma.done.wait (%p2953_p10), [#allocation8], 16  }
 0x163   : > { %2235 = vsyncadd (%p2954_p4), [#allocation8], 4294967280  ;;  %p2955_p12 = pmov %p2949_p1 }
 0x164   : > { %p2956_p3 = pmov %p2949_p1 }
 0x165   : > { %2237 = dma.done.wait (%p2955_p12), [#allocation17], 1040  }
 0x166   : > { %2239 = vsyncadd (%p2956_p3), [#allocation17], 4294966256  ;;  %p2957_p2 = pmov %p2949_p1 }
 0x167   : > { %p2958_p0 = pmov %p2949_p1 }
 0x168   : > { %2241 = dma.done.wait (%p2957_p2), [#allocation20], 16  }
 0x169   : > { %2243 = vsyncadd (%p2958_p0), [#allocation20], 4294967280  ;;  %s2959_s22 = sld [smem:[#allocation31_spill]] }
 0x16f   : > { %p707_p9 = scmp.eq.s32.totalorder %s2959_s22, 0 }
 0x170   : > { %v713_v0 = vld [vmem:[#allocation7] sm:$0xff] (%p707_p9)  ;;  %v1507_v1 = vld [vmem:[#allocation4] ss:$0 sm:$0xff] (%p707_p9) }
 0x171   : > { %712 = sbr.rel (!%p707_p9) target bundleno = 376 (0x178), region = 120  ;;  %v721_v2 = vadd.f32 (%p707_p9), %v1507_v1, %v713_v0 }
 0x173   : > { %722 = vst [vmem:[#allocation2] sm:$0xff] (%p707_p9), %v721_v2 }
 0x178 PF: > { %v1770_v3 = vld [vmem:[%s2762_s4 + $0x4] ss:$8 sps:$4 sm:$0xff]   ;;  %v1772_v4 = vld [vmem:[%s2762_s4] ss:$8 sps:$4 sm:$0xff]   ;;  %v2288_v5 = vmov 0   ;;  %v1798_v18 = vld [vmem:[%s2771_s21 + $0x50] sm:$0xff]   ;;  %v747_v38 = vlaneseq }
 0x179   : > { %869 = vmatprep.mubr.bf16.mxu0 %v2288_v5  ;;  %837 = vmatprep.subr.bf16.mxu0 %v1770_v3  ;;  %v1773_v6 = vld [vmem:[%s2762_s4 + $0x14] ss:$8 sps:$4 sm:$0xff]   ;;  %v1775_v7 = vld [vmem:[%s2762_s4 + $0x10] ss:$8 sps:$4 sm:$0xff]   ;;  %v1776_v8 = vld [vmem:[%s2762_s4 + $0x24] ss:$8 sps:$4 sm:$0xff]  }
 0x17a   : > { %838 = vmatpush1.bf16.msra.mxu0 %v1772_v4  ;;  %v1778_v9 = vld [vmem:[%s2762_s4 + $0x20] ss:$8 sps:$4 sm:$0xff]   ;;  %v1779_v10 = vld [vmem:[%s2762_s4 + $0x34] ss:$8 sps:$4 sm:$0xff]   ;;  %v1781_v11 = vld [vmem:[%s2762_s4 + $0x30] ss:$8 sps:$4 sm:$0xff]  }
 0x17b   : > { %839 = vmatprep.subr.bf16.mxu0 %v1773_v6  ;;  %v1782_v12 = vld [vmem:[%s2762_s4 + $0x44] ss:$8 sps:$4 sm:$0xff]   ;;  %v1784_v15 = vld [vmem:[%s2762_s4 + $0x40] ss:$8 sps:$4 sm:$0xff]   ;;  %v1785_v19 = vld [vmem:[%s2762_s4 + $0x54] ss:$8 sps:$4 sm:$0xff]  }
 0x17c   : > { %v1794_v13 = vld [vmem:[%s2771_s21 + $0x40] sm:$0xff]   ;;  %v1796_v16 = vld [vmem:[%s2771_s21 + $0x48] sm:$0xff]   ;;  %v1799_v21 = vld [vmem:[%s2771_s21 + $0x10] sm:$0xff]   ;;  %v748_v39 = vshrl.u32 %v747_v38, 7  ;;  %s2960_s17 = sld [smem:[#allocation31_spill]] }
 0x17d   : > { %v1795_v14 = vld [vmem:[%s2771_s21] sm:$0xff]   ;;  %1564 = vmatprep.subr.bf16.mxu1 %v1794_v13  ;;  %v1797_v17 = vld [vmem:[%s2771_s21 + $0x8] sm:$0xff]   ;;  %v1800_v22 = vld [vmem:[%s2771_s21 + $0x58] sm:$0xff]  }
 0x17e   : > { %840 = vmatpush1.bf16.msra.mxu0 %v1775_v7  ;;  %1565 = vmatpush3.bf16.msra.mxu1 %v1795_v14  ;;  %v1787_v20 = vld [vmem:[%s2762_s4 + $0x50] ss:$8 sps:$4 sm:$0xff]   ;;  %v1788_v23 = vld [vmem:[%s2762_s4 + $0x64] ss:$8 sps:$4 sm:$0xff]   ;;  %v1790_v24 = vld [vmem:[%s2762_s4 + $0x60] ss:$8 sps:$4 sm:$0xff]  }
 0x17f   : > { %841 = vmatprep.subr.bf16.mxu0 %v1776_v8  ;;  %1566 = vmatprep.subr.bf16.mxu1 %v1796_v16  ;;  %v1791_v25 = vld [vmem:[%s2762_s4 + $0x74] ss:$8 sps:$4 sm:$0xff]   ;;  %v1802_v27 = vld [vmem:[%s2771_s21 + $0x60] sm:$0xff]   ;;  %v1793_v29 = vld [vmem:[%s2762_s4 + $0x70] ss:$8 sps:$4 sm:$0xff]   ;;  %v749_v40 = vsub.s32 0, %v748_v39 }
 0x180   : > { %v1801_v26 = vld [vmem:[%s2771_s21 + $0x18] sm:$0xff]   ;;  %v1803_v28 = vld [vmem:[%s2771_s21 + $0x20] sm:$0xff]   ;;  %v727_v30 = vld [vmem:[#allocation2] sm:$0xff]  ;;  %v753_v42 = vsub.s32 1, %v748_v39 }
 0x181   : > { %v1804_v31 = vld [vmem:[%s2771_s21 + $0x68] sm:$0xff]   ;;  %v728_v32 = vpack.c.bf16 %v727_v30, %v727_v30  ;;  %v1806_v34 = vld [vmem:[%s2771_s21 + $0x70] sm:$0xff]   ;;  %v1808_v36 = vld [vmem:[%s2771_s21 + $0x78] sm:$0xff]  }
 0x182   : > { %842 = vmatpush1.bf16.msra.mxu0 %v1778_v9  ;;  %1567 = vmatpush3.bf16.msra.mxu1 %v1797_v17  ;;  %v1805_v33 = vld [vmem:[%s2771_s21 + $0x28] sm:$0xff]   ;;  %v1807_v35 = vld [vmem:[%s2771_s21 + $0x30] sm:$0xff]   ;;  %v1809_v37 = vld [vmem:[%s2771_s21 + $0x38] sm:$0xff]   ;;  %p1096_p11 = scmp.eq.s32.totalorder %s2960_s17, 1 }
 0x183   : > { %843 = vmatprep.subr.bf16.mxu0 %v1779_v10  ;;  %1568 = vmatprep.subr.bf16.mxu1 %v1798_v18  ;;  %v745_v41 = vld [vmem:[%s2769_s12] sm:$0x3]  ;;  %v1540_v60 = vld [vmem:[%s613_s0] ss:$0 sm:$0xff]  ;;  %v2289_v14 = vmov (%p1096_p11), 0.0   ;;  %vm2290_vm0 = vmmov (%p1096_p11), 0  }
 0x184   : > { %v750_v43 = vrot.slane %v745_v41, %v749_v40  ;;  %v754_v44 = vrot.slane %v745_v41, %v753_v42  ;;  %v1541_v7 = vld [vmem:[%s621_s14] ss:$0 sm:$0xff] }
 0x185   : > { %v1542_v9 = vld [vmem:[%s629_s3] ss:$0 sm:$0xff] }
 0x186   : > { %844 = vmatpush1.bf16.msra.mxu0 %v1781_v11  ;;  %1569 = vmatpush3.bf16.msra.mxu1 %v1799_v21  ;;  %v1812_v13 = vld [vmem:[#allocation18] sm:$0xff] (%p1096_p11)   ;;  %v1815_v21 = vld [vmem:[#allocation18 + $0x18] sm:$0xff] (%p1096_p11)  }
 0x187   : > { %845 = vmatprep.subr.bf16.mxu0 %v1782_v12  ;;  %1570 = vmatprep.subr.bf16.mxu1 %v1800_v22  ;;  %v1816_v22 = vld [vmem:[#allocation18 + $0x20] sm:$0xff] (%p1096_p11)  }
 0x18a   : > { %846 = vmatpush1.bf16.msra.mxu0 %v1784_v15  ;;  %1571 = vmatpush3.bf16.msra.mxu1 %v1801_v26  ;;  %v1813_v15 = vld [vmem:[#allocation18 + $0x8] sm:$0xff] (%p1096_p11)  }
 0x18b   : > { %847 = vmatprep.subr.bf16.mxu0 %v1785_v19  ;;  %1572 = vmatprep.subr.bf16.mxu1 %v1802_v27 }
 0x18e   : > { %848 = vmatpush1.bf16.msra.mxu0 %v1787_v20  ;;  %1573 = vmatpush3.bf16.msra.mxu1 %v1803_v28  ;;  %v1814_v20 = vld [vmem:[#allocation18 + $0x10] sm:$0xff] (%p1096_p11)  }
 0x18f   : > { %849 = vmatprep.subr.bf16.mxu0 %v1788_v23  ;;  %1574 = vmatprep.subr.bf16.mxu1 %v1804_v31  ;;  %v1817_v23 = vld [vmem:[#allocation18 + $0x28] sm:$0xff] (%p1096_p11)  }
 0x192   : > { %850 = vmatpush1.bf16.msra.mxu0 %v1790_v24  ;;  %1575 = vmatpush3.bf16.msra.mxu1 %v1805_v33  ;;  %v1818_v24 = vld [vmem:[#allocation18 + $0x30] sm:$0xff] (%p1096_p11)  }
 0x193   : > { %851 = vmatprep.subr.bf16.mxu0 %v1791_v25  ;;  %1576 = vmatprep.subr.bf16.mxu1 %v1806_v34  ;;  %v1819_v25 = vld [vmem:[#allocation18 + $0x38] sm:$0xff] (%p1096_p11)  }
 0x196   : > { %852 = vmatpush1.bf16.msra.mxu0 %v1793_v29  ;;  %1577 = vmatpush3.bf16.msra.mxu1 %v1807_v35 }
 0x197   : > { %1578 = vmatprep.subr.bf16.mxu1 %v1808_v36  ;;  %1595 = vmatprep.subr.bf16.mxu0 (%p1096_p11), %v2289_v14  ;;  %v1546_v36 = vld [vmem:[#allocation19] ss:$0 sm:$0xff] (%p1096_p11) }
 0x199   : > { %870 = vmatmul.mubr.bf16.vlgmr.msra.gmra.mrb[0].mxu0 %v728_v32  ;;  %v1545_v32 = vld [vmem:[#allocation16] ss:$0 sm:$0xff] (%p1096_p11) }
 0x19a   : > { %1579 = vmatpush3.bf16.msra.mxu1 %v1809_v37  ;;  %1596 = vmatpush3.bf16.msra.mxu0 (%p1096_p11), %v1812_v13 }
 0x19b   : > { %1597 = vmatprep.subr.bf16.mxu0 (%p1096_p11), %v2289_v14  ;;  %1611 = vmatprep.mubr.msk.bf16.mxu0 (%p1096_p11), %vm2290_vm0, %v2289_v14 }
 0x19e   : > { %1598 = vmatpush3.bf16.msra.mxu0 (%p1096_p11), %v1813_v15 }
 0x19f   : > { %1599 = vmatprep.subr.bf16.mxu0 (%p1096_p11), %v2289_v14 }
 0x1a2   : > { %1600 = vmatpush3.bf16.msra.mxu0 (%p1096_p11), %v1814_v20 }
 0x1a3   : > { %1601 = vmatprep.subr.bf16.mxu0 (%p1096_p11), %v2289_v14 }
 0x1a6   : > { %1602 = vmatpush3.bf16.msra.mxu0 (%p1096_p11), %v1815_v21 }
 0x1a7   : > { %1603 = vmatprep.subr.bf16.mxu0 (%p1096_p11), %v2289_v14 }
 0x1aa   : > { %1604 = vmatpush3.bf16.msra.mxu0 (%p1096_p11), %v1816_v22 }
 0x1ab   : > { %1605 = vmatprep.subr.bf16.mxu0 (%p1096_p11), %v2289_v14 }
 0x1ae   : > { %1606 = vmatpush3.bf16.msra.mxu0 (%p1096_p11), %v1817_v23 }
 0x1af   : > { %1607 = vmatprep.subr.bf16.mxu0 (%p1096_p11), %v2289_v14 }
 0x1b2   : > { %1608 = vmatpush3.bf16.msra.mxu0 (%p1096_p11), %v1818_v24 }
 0x1b3   : > { %1609 = vmatprep.subr.bf16.mxu0 (%p1096_p11), %v2289_v14 }
 0x1b6   : > { %1610 = vmatpush3.bf16.msra.mxu0 (%p1096_p11), %v1819_v25 }
 0x26c   : > { %v871_v45 = vpop.f32.mrb[0].mxu0 }
 0x26d   : > { %v872_v46 = vadd.f32 %v871_v45, %v750_v43  ;;  %v873_v47 = vpop.f32.mrb[1].mxu0 }
 0x26e   : > { %v874_v48 = vadd.f32 %v873_v47, %v754_v44  ;;  %v875_v49 = vpop.f32.mrb[2].mxu0 }
 0x26f   : > { %v878_v50 = vmax.f32 %v872_v46, 0.0  ;;  %v876_v51 = vpop.f32.mrb[3].mxu0 }
 0x270   : > { %v879_v52 = vmax.f32 %v874_v48, 0.0 }
 0x271   : > { %v881_v54 = vpack.c.bf16 %v878_v50, %v878_v50 }
 0x272   : > { %v882_v53 = vpack.c.bf16 %v879_v52, %v879_v52 }
 0x274   : > { %1043 = vmatprep.mubr.bf16.mxu1 %v882_v53 }
 0x275   : > { %1044 = vmatmul.mubr.bf16.vlgmr.msra.gmra.mrb[0].mxu1 %v881_v54 }
 0x348   : > { %v1580_v55 = vpop.f32.mrb[0].mxu1 }
 0x349   : > { %v1581_v56 = vpop.f32.mrb[1].mxu1 }
 0x34a   : > { %v1582_v57 = vadd.f32 %v1581_v56, %v1580_v55  ;;  %v1583_v58 = vpop.f32.mrb[2].mxu1 }
 0x34b   : > { %v1584_v59 = vpop.f32.mrb[3].mxu1 }
 0x34c   : > { %v1058_v61 = vadd.f32 %v1582_v57, %v727_v30  ;;  %v1544_v30 = vld [vmem:[#allocation15] ss:$0 sm:$0xff] (%p1096_p11) }
 0x34e   : > { %v1066_v62 = vadd.f32 %v1540_v60, %v1058_v61 }
 0x350   : > { %1069 = vadd.xlane.f32.xlu0 %v1066_v62 }
 0x3dd   : > { %v1070_v63 = vpop.xlane.xlu0 %1069 }
 0x3de   : > { %v1072_v0 = vmul.f32 0.0078125, %v1070_v63 }
 0x3e0   : > { %v1073_v1 = vsub.f32 %v1066_v62, %v1072_v0 }
 0x3e2   : > { %v1074_v2 = vmul.f32 %v1073_v1, %v1073_v1 }
 0x3e4   : > { %1075 = vadd.xlane.f32.xlu0 %v1074_v2 }
 0x471   : > { %v1076_v3 = vpop.xlane.xlu0 %1075 }
 0x472   : > { %v1077_v4 = vmul.f32 0.0078125, %v1076_v3 }
 0x474   : > { %v1078_v5 = vadd.f32 1e-05, %v1077_v4 }
 0x476   : > { %1810 = vrsqrt.f32 %v1078_v5 }
 0x480   : > { %v1811_v6 = vpop.eup %1810 }
 0x481   : > { %v1080_v8 = vmul.f32 %v1811_v6, %v1073_v1  ;;  %1100 = sbr.rel (!%p1096_p11) target bundleno = 1695 (0x69f), region = 132 }
 0x483   : > { %v1087_v10 = vmul.f32 %v1541_v7, %v1080_v8 }
 0x485   : > { %v1094_v11 = vadd.f32 %v1542_v9, %v1087_v10 }
 0x487   : > { %1095 = vst [vmem:[#allocation2] sm:$0xff] %v1094_v11 }
 0x48e   : > { %v1101_v12 = vld [vmem:[#allocation2] sm:$0xff] }
 0x48f   : > { %1104 = vadd.xlane.f32.xlu0 %v1101_v12 }
 0x51c   : > { %v1105_v16 = vpop.xlane.xlu0 %1104 }
 0x51d   : > { %v1107_v17 = vmul.f32 0.0078125, %v1105_v16 }
 0x51f   : > { %v1108_v18 = vsub.f32 %v1101_v12, %v1107_v17 }
 0x521   : > { %v1109_v19 = vmul.f32 %v1108_v18, %v1108_v18 }
 0x523   : > { %1110 = vadd.xlane.f32.xlu0 %v1109_v19 }
 0x5b0   : > { %v1111_v26 = vpop.xlane.xlu0 %1110 }
 0x5b1   : > { %v1112_v27 = vmul.f32 0.0078125, %v1111_v26 }
 0x5b3   : > { %v1113_v28 = vadd.f32 1e-05, %v1112_v27 }
 0x5b5   : > { %1820 = vrsqrt.f32 %v1113_v28 }
 0x5bf   : > { %v1821_v29 = vpop.eup %1820 }
 0x5c0   : > { %v1115_v31 = vmul.f32 %v1821_v29, %v1108_v18 }
 0x5c2   : > { %v1122_v33 = vmul.f32 %v1544_v30, %v1115_v31 }
 0x5c4   : > { %v1129_v34 = vadd.f32 %v1545_v32, %v1122_v33 }
 0x5c6   : > { %v1130_v35 = vpack.c.bf16 %v1129_v34, %v1129_v34 }
 0x5c8   : > { %1612 = vmatmul.mubr.bf16.vlgmr.msra.gmra.mrb[0].mxu0 %v1130_v35 }
 0x69b   : > { %v1236_v37 = vpop.f32.mrb[0].mxu0 }
 0x69c   : > { %v1237_v38 = vadd.f32 %v1546_v36, %v1236_v37  ;;  %v1613_v39 = vpop.f32.mrb[1].mxu0 }
 0x69d   : > { %v1239_v40 = vpop.f32.mrb[2].mxu0 }
 0x69e   : > { %1242 = vst [vmem:[#allocation21] sm:$0xff] %v1237_v38  ;;  %v1614_v41 = vpop.f32.mrb[3].mxu0 }
 0x69f PF: > { %p1706_p5 = scmp.eq.s32.totalorder %s2386_s27, 1  ;;  %s2291_s16 = smov [#allocation21]  }
 0x6a0   : > { %s1252_s26 = sshll.u32 %s2291_s16, 4  ;;  %s1253_s26 = int_to_ptr.vmem [resolvable:$true] %s1252_s26 }
 0x6a1   : > { %s2170_s20 = scalar_lea.vmem %s1253_s26, 128  ;;  %p2177_p1 = scmp.lt.s32.totalorder %s1253_s26, %s1253_s26 }
 0x6a2   : > { %p2171_p6 = scmp.ne.s32.totalorder %s1253_s26, %s2170_s20  ;;  %p2178_p7 = scmp.lt.s32.totalorder %s2170_s20, %s2170_s20 }
 0x6a4   : > { %p2172_p8 = pnand %p2171_p6, %p1706_p5  ;;  %p2179_p10 = por %p2178_p7, %p2177_p1 }
 0x6a6   : > { %p2173_p13 = pneg %p2172_p8 }
 0x6a8   : > { %p2180_p4 = pnand %p2179_p10, %p2173_p13 }
 0x6aa   : > { %2183 = shalt.err (!%p2180_p4)
}
 0x6ab   : > { %s2961_s15 = sld [smem:[#allocation40_spill]] }
 0x6b1   : > { %s2184_s18 = scalar_lea.hbm %s2961_s15, 128 }
 0x6b2   : > { %p2185_p12 = scmp.ne.s32.totalorder %s2961_s15, %s2184_s18  ;;  %p2190_p0 = scmp.lt.u32.totalorder %s2184_s18, %s2961_s15 }
 0x6b4   : > { %p2186_p3 = pnand %p2185_p12, %p1706_p5 }
 0x6b6   : > { %p2187_p2 = pneg %p2186_p3 }
 0x6b8   : > { %p2192_p9 = pnand %p2190_p0, %p2187_p2 }
 0x6ba   : > { %2195 = shalt.err (!%p2192_p9)
}
 0x6bb   : > { %1652 = dma.vmem_to_hbm [thread:$0]  (%p1706_p5), %s1253_s26, 128, %s2961_s15, [#allocation6]  }
 0x6bc   : > { %2245 = dma.done.wait (%p1706_p5), [#allocation6], 128  }
 0x6bd   : > { %2247 = vsyncadd (%p1706_p5), [#allocation6], 4294967168 }
 0x6be PF: > { %s2962_s13 = sld [smem:[#allocation32_spill]]  ;;  %s2963_s21 = sld [smem:[#allocation29_spill]] }
 0x6bf   : > { %s2964_s22 = sld [smem:[#allocation30_spill]]  ;;  %s2965_s23 = sld [smem:[#allocation35_spill]] }
 0x6c0   : > { %s2966_s12 = sld [smem:[#allocation34_spill]]  ;;  %s2967_s24 = smov %s2266_s25 }
 0x6c4   : > { %s27_s26 = sadd.s32 1, %s2962_s13  }
 0x6c5   : > { %p24_p11 = scmp.ge.s32.totalorder %s27_s26, 4  }
 0x6c6   : > { %s2968_s25 = smov %s2966_s12 }
 0x6c7   :  { %26 = sbr.rel (!%p24_p11) target bundleno = 13 (0xd), region = 201 }
 0x6ce   :  { %1265 = vsyncpa [#allocation5], 1 }
 0x6cf   :  { %1267 = vsyncpa [#allocation5 + $0x1], 1 }
 0x6d0   :  { %1268 = vsyncpa [#allocation8], 1 }
 0x6d1   :  { %1269 = vsyncpa [#allocation17], 1 }
 0x6d2   :  { %1270 = vsyncpa [#allocation20], 1 }
 0x6d3   :  { %1271 = vsyncpa [#allocation6], 1 }
 0x6d4   :  { %1273 = vsyncpa [#allocation6 + $0x1], 1 }

</bundles_post_ra>
